<compile_context>
chip_gen: v7x
topology: tpu7x:2x2x1
jax: 0.10.0
libtpu: 0.0.40
codegen_flags: <defaults>
</compile_context>

<pallas_src>
import jax
import jax.numpy as jnp
import numpy as np
from jax.experimental import pallas as pl
from jax.experimental.pallas import tpu as pltpu


def _ect_points_kernel(x_ref, v_ref, lin_ref, oh_ref, out_ref):
    """One (column-tile c, node-tile k) grid step.

    x_ref   : [Nt, F_pad]   f32   node coordinates (zero-padded rows/cols)
    v_ref   : [F_pad, CT]   f32   (-100 * v) tiled across bump steps
    lin_ref : [1, CT]       f32   (100 * lin) repeated across thetas
    oh_ref  : [B_pad, Nt]   bf16  one-hot node->graph scatter matrix
    out_ref : [B_pad, CT]   f32   resident accumulator (same block for all k)
    """
    k = pl.program_id(1)

    @pl.when(k == 0)
    def _init():
        out_ref[...] = jnp.zeros_like(out_ref)

    # z[n, s*T + t] = -100 * nh[n, t]   (slope folded into v on the host)
    z = jnp.dot(x_ref[...], v_ref[...], preferred_element_type=jnp.float32)

    # ecc = sigmoid(200*(lin - nh)) = 0.5 * tanh(100*lin - 100*nh) + 0.5
    # -> exactly one EUP push per element.
    ecc = 0.5 * jnp.tanh(z + lin_ref[...]) + 0.5

    # torch.index_add over `batch` == one-hot scatter matmul.
    # bf16 MXU inputs (onehot is exact in bf16), f32 accumulation.
    out_ref[...] += jnp.dot(oh_ref[...], ecc.astype(jnp.bfloat16),
                            preferred_element_type=jnp.float32)


def _pick_col_tile(st, max_ct=2048):
    """Largest column tile <= max_ct that is a multiple of 128 dividing S*T."""
    if st % 128 != 0:
        return st  # fall back to a single full-width block (== full array dim)
    ct = min(st, max_ct)
    while st % ct != 0:
        ct -= 128
    return ct


def ect_points_forward(x, v, batch, lin, num_graphs):
    N, F = x.shape
    _, T = v.shape
    S = lin.shape[0]
    B = num_graphs
    ST = S * T

    # ---- static tile geometry -------------------------------------------
    F_pad = max(8, pl.cdiv(F, 8) * 8)
    n_tile = min(512, pl.cdiv(N, 128) * 128)          # lane-aligned N tile
    N_pad = pl.cdiv(N, n_tile) * n_tile
    B_pad = max(8, pl.cdiv(B, 8) * 8)                 # sublane-aligned graphs
    ct = _pick_col_tile(ST)
    num_ct = ST // ct
    num_nt = N_pad // n_tile

    # ---- host-side prep (tiny arrays, one-time) ---------------------------
    x_p = jnp.zeros((N_pad, F_pad), jnp.float32).at[:N, :F].set(
        x.astype(jnp.float32))

    # Fold sigmoid slope (200) and tanh half-angle (0.5) into v and lin:
    #   sigmoid(200*(lin - nh)) = 0.5*tanh(100*lin - 100*nh) + 0.5
    v_scaled = (-100.0) * v.astype(jnp.float32)                       # [F, T]
    v_rep = jnp.zeros((F_pad, ST), jnp.float32).at[:F, :].set(
        jnp.tile(v_scaled, (1, S)))                                   # [F_pad, S*T]
    lin_rep = jnp.repeat(100.0 * lin.astype(jnp.float32), T).reshape(1, ST)

    # One-hot scatter matrix built directly as [B_pad, N_pad] (no transpose);
    # padded nodes map to graph -1 -> all-zero column -> no contribution.
    batch_p = jnp.full((N_pad,), -1, jnp.int32).at[:N].set(batch.astype(jnp.int32))
    onehot = (jnp.arange(B_pad, dtype=jnp.int32)[:, None] == batch_p[None, :]
              ).astype(jnp.bfloat16)                                  # [B_pad, N_pad]

    out_flat = pl.pallas_call(
        _ect_points_kernel,
        out_shape=jax.ShapeDtypeStruct((B_pad, ST), jnp.float32),
        grid=(num_ct, num_nt),
        in_specs=[
            pl.BlockSpec((n_tile, F_pad), lambda c, k: (k, 0)),   # x
            pl.BlockSpec((F_pad, ct),     lambda c, k: (0, c)),   # -100*v tiled
            pl.BlockSpec((1, ct),         lambda c, k: (0, c)),   # 100*lin repeated
            pl.BlockSpec((B_pad, n_tile), lambda c, k: (0, k)),   # onehot
        ],
        out_specs=pl.BlockSpec((B_pad, ct), lambda c, k: (0, c)),
        compiler_params=pltpu.CompilerParams(
            dimension_semantics=("parallel", "arbitrary"),
            vmem_limit_bytes=48 * 1024 * 1024),
    )(x_p, v_rep, lin_rep, onehot)

    # [B_pad, S*T] -> [B, S, T]: contiguous reshape + slice, no transpose.
    return out_flat[:B].reshape(B, S, T)


# TODO(synk): 'edges'/'faces' ECT variants additionally need a gather + max
# over data.edge_index / data.face node ids (eh = nh[edge_index].max(0));
# only the 'points' hot path is implemented as a Pallas kernel here.


def _reference_points(x, v, batch, lin, num_graphs):
    nh = jnp.dot(x.astype(jnp.float32), v.astype(jnp.float32),
                 precision=jax.lax.Precision.HIGHEST)               # [N, T]
    ecc = jax.nn.sigmoid(200.0 * (lin[:, None, None] - nh[None]))   # [S, N, T]
    S, _, T = ecc.shape
    out = jnp.zeros((S, num_graphs, T), jnp.float32)
    out = out.at[:, batch, :].add(ecc)
    return jnp.moveaxis(out, 0, 1)                                  # [B, S, T]


if __name__ == "__main__":
    key = jax.random.PRNGKey(0)
    k_x, k_v = jax.random.split(key)

    bump_steps, num_features, num_thetas, R = 8, 2, 64, 1.1
    N, num_graphs = 32, 2

    # EctLayer.__init__ (fixed=False): random directions, per-theta normalized.
    v0 = jax.random.uniform(k_v, (num_features, num_thetas)) - 0.5
    vt = v0.T                                                       # [T, F]
    vt = vt / jnp.sqrt(jnp.sum(vt ** 2, axis=1, keepdims=True))
    v = vt.T                                                        # [F, T]
    lin = jnp.linspace(-R, R, bump_steps)                           # [S]

    # data.x / data.batch: two graphs of 16 points each.
    x = 0.5 * jax.random.normal(k_x, (N, num_features), jnp.float32)
    batch = jnp.concatenate([jnp.zeros(16, jnp.int32), jnp.ones(16, jnp.int32)])

    out = ect_points_forward(x, v, batch, lin, num_graphs)
    out = jax.block_until_ready(out)

    ref = _reference_points(x, v, batch, lin, num_graphs)
    assert out.shape == (num_graphs, bump_steps, num_thetas)
    # Tolerance accounts for the bf16 MXU inputs of the scatter matmul
    # (onehot is exact in bf16; ecc in [0,1] rounds at ~2e-3 abs per element).
    np.testing.assert_allclose(np.asarray(out), np.asarray(ref),
                               rtol=2e-2, atol=5e-2)
    print("KERNEL_OK")
</pallas_src>

<mosaic_0001>
module attributes {stable_mosaic.version = 11 : i64} {
  func.func @_ect_points_kernel(%arg0: i32, %arg1: i32, %arg2: memref<128x8xf32, #tpu.memory_space<vmem>>, %arg3: memref<8x512xf32, #tpu.memory_space<vmem>>, %arg4: memref<1x512xf32, #tpu.memory_space<vmem>>, %arg5: memref<8x128xbf16, #tpu.memory_space<vmem>>, %arg6: memref<8x512xf32, #tpu.memory_space<vmem>>) attributes {dimension_semantics = [#tpu.dimension_semantics<parallel>, #tpu.dimension_semantics<arbitrary>], iteration_bounds = array<i64: 1, 1>, scalar_prefetch = 0 : i64, scratch_operands = 0 : i64, tpu.core_type = #tpu.core_type<tc>, window_params = [{transform_indices = @transform_0, window_bounds = array<i64: 128, 8>}, {transform_indices = @transform_1, window_bounds = array<i64: 8, 512>}, {transform_indices = @transform_2, window_bounds = array<i64: 1, 512>}, {transform_indices = @transform_3, window_bounds = array<i64: 8, 128>}, {transform_indices = @transform_4, window_bounds = array<i64: 8, 512>}]} {
    %c0_i32 = arith.constant 0 : i32
    %0 = arith.cmpi eq, %arg1, %c0_i32 : i32
    %1 = arith.extui %0 : i1 to i32
    %c0_i32_0 = arith.constant 0 : i32
    %2 = arith.cmpi ne, %1, %c0_i32_0 : i32
    scf.if %2 {
      %cst_15 = arith.constant 0.000000e+00 : f32
      %20 = vector.broadcast %cst_15 : f32 to vector<8x512xf32>
      %c0_16 = arith.constant 0 : index
      %c0_17 = arith.constant 0 : index
      %21 = vector.load %arg6[%c0_16, %c0_17] : memref<8x512xf32, #tpu.memory_space<vmem>>, vector<8x512xf32>
      tpu.vector_store %arg6[%c0_16, %c0_17], %20 {strides = array<i32>} : memref<8x512xf32, #tpu.memory_space<vmem>>, vector<8x512xf32>,
    } else {
    }
    %c0 = arith.constant 0 : index
    %c0_1 = arith.constant 0 : index
    %3 = vector.load %arg2[%c0, %c0_1] : memref<128x8xf32, #tpu.memory_space<vmem>>, vector<128x8xf32>
    %c0_2 = arith.constant 0 : index
    %c0_3 = arith.constant 0 : index
    %4 = vector.load %arg3[%c0_2, %c0_3] : memref<8x512xf32, #tpu.memory_space<vmem>>, vector<8x512xf32>
    %cst = arith.constant dense<0.000000e+00> : vector<128x512xf32>
    %5 = tpu.matmul %3, %4, %cst {dimension_numbers = #tpu.dot_dimension_numbers<[1], [0], [0], [1], [0, 0, 1, 1], [], []>} : vector<128x8xf32>, vector<8x512xf32>, vector<128x512xf32> -> vector<128x512xf32>
    %c0_4 = arith.constant 0 : index
    %c0_5 = arith.constant 0 : index
    %6 = vector.load %arg4[%c0_4, %c0_5] : memref<1x512xf32, #tpu.memory_space<vmem>>, vector<1x512xf32>
    %7 = vector.broadcast %6 : vector<1x512xf32> to vector<128x512xf32>
    %8 = arith.addf %5, %7 : vector<128x512xf32>
    %9 = math.tanh %8 : vector<128x512xf32>
    %cst_6 = arith.constant 5.000000e-01 : f32
    %10 = vector.broadcast %cst_6 : f32 to vector<128x512xf32>
    %11 = arith.mulf %10, %9 : vector<128x512xf32>
    %cst_7 = arith.constant 5.000000e-01 : f32
    %12 = vector.broadcast %cst_7 : f32 to vector<128x512xf32>
    %13 = arith.addf %11, %12 : vector<128x512xf32>
    %c0_8 = arith.constant 0 : index
    %c0_9 = arith.constant 0 : index
    %14 = vector.load %arg6[%c0_8, %c0_9] : memref<8x512xf32, #tpu.memory_space<vmem>>, vector<8x512xf32>
    %c0_10 = arith.constant 0 : index
    %c0_11 = arith.constant 0 : index
    %15 = vector.load %arg5[%c0_10, %c0_11] : memref<8x128xbf16, #tpu.memory_space<vmem>>, vector<8x128xbf16>
    %16 = arith.truncf %13 : vector<128x512xf32> to vector<128x512xbf16>
    %cst_12 = arith.constant dense<0.000000e+00> : vector<8x512xf32>
    %17 = tpu.matmul %15, %16, %cst_12 {dimension_numbers = #tpu.dot_dimension_numbers<[1], [0], [0], [1], [0, 0, 1, 1], [], []>} : vector<8x128xbf16>, vector<128x512xbf16>, vector<8x512xf32> -> vector<8x512xf32>
    %18 = arith.addf %14, %17 : vector<8x512xf32>
    %c0_13 = arith.constant 0 : index
    %c0_14 = arith.constant 0 : index
    %19 = vector.load %arg6[%c0_13, %c0_14] : memref<8x512xf32, #tpu.memory_space<vmem>>, vector<8x512xf32>
    tpu.vector_store %arg6[%c0_13, %c0_14], %18 {strides = array<i32>} : memref<8x512xf32, #tpu.memory_space<vmem>>, vector<8x512xf32>,
    return
  }
  func.func @transform_0(%arg0: i32, %arg1: i32) -> (i32, i32) {
    %c0_i32 = arith.constant 0 : i32
    %c0_i32_0 = arith.constant 0 : i32
    return %arg1, %c0_i32 : i32, i32
  }
  func.func @transform_1(%arg0: i32, %arg1: i32) -> (i32, i32) {
    %c0_i32 = arith.constant 0 : i32
    %c0_i32_0 = arith.constant 0 : i32
    return %c0_i32, %arg0 : i32, i32
  }
  func.func @transform_2(%arg0: i32, %arg1: i32) -> (i32, i32) {
    %c0_i32 = arith.constant 0 : i32
    %c0_i32_0 = arith.constant 0 : i32
    return %c0_i32, %arg0 : i32, i32
  }
  func.func @transform_3(%arg0: i32, %arg1: i32) -> (i32, i32) {
    %c0_i32 = arith.constant 0 : i32
    %c0_i32_0 = arith.constant 0 : i32
    return %c0_i32, %arg1 : i32, i32
  }
  func.func @transform_4(%arg0: i32, %arg1: i32) -> (i32, i32) {
    %c0_i32 = arith.constant 0 : i32
    %c0_i32_0 = arith.constant 0 : i32
    return %c0_i32, %arg0 : i32, i32
  }
}

</mosaic_0001>

<bundles_post_ra>
// kernel: tpu_custom_call.1
= control target key start
LH: loop header
LB: loop body
LE: loop exit
PB: predicated region body
PF: predicated region fallthrough
CT: control target
= control target key end

     0   :  { %vm69_vm0 = vcmask 64512   ;;  %v960_v5 = vmov 0.0   ;;  %s1283_s0 = inlined_call_operand.vmem [shape: f32[128,8], index: 0, kind: input, shape index: {}]   ;;  %s1284_s1 = inlined_call_operand.vmem [shape: f32[8,512], index: 1, kind: input, shape index: {}]   ;;  %s1285_s2 = inlined_call_operand.vmem [shape: f32[1,512], index: 2, kind: input, shape index: {}]   ;;  %s1286_s3 = inlined_call_operand.vmem [shape: bf16[8,128], index: 3, kind: input, shape index: {}]   ;;  %s1287_s4 = inlined_call_operand.hbm [shape: f32[8,512], index: 4, kind: output, shape index: {}]  }
   0x1   :  { %v44_v0 = vld [vmem:[%s1284_s1 + $0x8] sm:$0xff]  ;;  %v46_v1 = vld [vmem:[%s1284_s1 + $0x18] sm:$0xff]  ;;  %v43_v2 = vld [vmem:[%s1284_s1] sm:$0xff]  ;;  %182 = vmatprep.mubr.f32.mxu0 %v960_v5  ;;  %343 = vmatprep.mubr.f32.mxu1 %v960_v5 }
   0x2   :  { %118 = vmatprep.subr.mxu0 %v44_v0  ;;  %279 = vmatprep.subr.mxu1 %v46_v1  ;;  %v45_v3 = vld [vmem:[%s1284_s1 + $0x10] sm:$0xff]  ;;  %v27_v4 = vld [vmem:[%s1283_s0] sm:$0xff]  ;;  %v28_v6 = vld [vmem:[%s1283_s0 + $0x8] sm:$0xff] }
   0x3   :  { %119 = vmatpush1.msra.mxu0 %v43_v2  ;;  %280 = vmatpush1.msra.mxu1 %v45_v3 }
   0x4   :  { %773 = vmatmul.mubr.msk.f32.vlgmr.msra.gmra.mrb[0].mxu0 %vm69_vm0, %v27_v4  ;;  %789 = vmatmul.mubr.msk.f32.vlgmr.msra.gmra.mrb[0].mxu1 %vm69_vm0, %v27_v4 }
   0x5   :  { %188 = vmatprep.mubr.f32.mxu0 %v960_v5  ;;  %349 = vmatprep.mubr.f32.mxu1 %v960_v5 }
   0x6   :  { %9 = vsyncpa [#allocation3], 0  ;;  %v29_v7 = vld [vmem:[%s1283_s0 + $0x10] sm:$0xff]  ;;  %v30_v8 = vld [vmem:[%s1283_s0 + $0x18] sm:$0xff]  ;;  %v961_v21 = vmov 0   ;;  %v49_v22 = vlaneseq  ;;  %s962_s29 = smov [#allocation2]  }
   0x7   :  { %v31_v9 = vld [vmem:[%s1283_s0 + $0x20] sm:$0xff]  ;;  %v32_v10 = vld [vmem:[%s1283_s0 + $0x28] sm:$0xff]  ;;  %v33_v11 = vld [vmem:[%s1283_s0 + $0x30] sm:$0xff]  ;;  %s765_s30 = sshll.u32 %s962_s29, 4  ;;  %s766_s30 = int_to_ptr.vmem [resolvable:$true] %s765_s30 }
   0x8   :  { %774 = vmatmul.mubr.msk.f32.gmra.mrb[2].mxu0 %vm69_vm0, %v28_v6  ;;  %790 = vmatmul.mubr.msk.f32.gmra.mrb[2].mxu1 %vm69_vm0, %v28_v6  ;;  %v34_v12 = vld [vmem:[%s1283_s0 + $0x38] sm:$0xff]  ;;  %v35_v13 = vld [vmem:[%s1283_s0 + $0x40] sm:$0xff]  ;;  %v36_v14 = vld [vmem:[%s1283_s0 + $0x48] sm:$0xff]  ;;  %v50_v23 = vshrl.u32 %v49_v22, 7  ;;  %s936_s5 = scalar_lea.vmem %s766_s30, 512  ;;  %p941_p1 = scmp.lt.s32.totalorder %s766_s30, %s766_s30 }
   0x9   :  { %194 = vmatprep.mubr.f32.mxu0 %v960_v5  ;;  %355 = vmatprep.mubr.f32.mxu1 %v960_v5  ;;  %v37_v15 = vld [vmem:[%s1283_s0 + $0x50] sm:$0xff]  ;;  %v38_v16 = vld [vmem:[%s1283_s0 + $0x58] sm:$0xff]  ;;  %v39_v17 = vld [vmem:[%s1283_s0 + $0x60] sm:$0xff]  ;;  %p937_p0 = scmp.ne.s32.totalorder %s766_s30, %s936_s5  ;;  %p942_p2 = scmp.lt.s32.totalorder %s936_s5, %s936_s5 }
   0xa   :  { %v40_v18 = vld [vmem:[%s1283_s0 + $0x68] sm:$0xff]  ;;  %v41_v19 = vld [vmem:[%s1283_s0 + $0x70] sm:$0xff]  ;;  %v42_v20 = vld [vmem:[%s1283_s0 + $0x78] sm:$0xff]  ;;  %v51_v24 = vsub.s32 0, %v50_v23  ;;  %v59_v25 = vsub.s32 2, %v50_v23  ;;  %v55_v27 = vsub.s32 1, %v50_v23 }
   0xb   :  { %v47_v26 = vld [vmem:[%s1285_s2] sm:$0xf]  ;;  %v63_v28 = vsub.s32 3, %v50_v23  ;;  %p943_p3 = por %p942_p2, %p941_p1 }
   0xc   :  { %775 = vmatmul.mubr.msk.f32.gmra.mrb[4].mxu0 %vm69_vm0, %v29_v7  ;;  %791 = vmatmul.mubr.msk.f32.gmra.mrb[4].mxu1 %vm69_vm0, %v29_v7  ;;  %v1115_v29 = vrot.slane %v47_v26, %v51_v24  ;;  %v1117_v30 = vrot.slane %v47_v26, %v59_v25  ;;  %v1119_v31 = vrot.slane %v47_v26, %v55_v27 }
   0xd   :  { %200 = vmatprep.mubr.f32.mxu0 %v960_v5  ;;  %361 = vmatprep.mubr.f32.mxu1 %v960_v5  ;;  %v1121_v32 = vrot.slane %v47_v26, %v63_v28  ;;  %p944_p4 = pnand %p943_p3, %p937_p0 }
  0x10   :  { %776 = vmatmul.mubr.msk.f32.gmra.mrb[6].mxu0 %vm69_vm0, %v30_v8  ;;  %792 = vmatmul.mubr.msk.f32.gmra.mrb[6].mxu1 %vm69_vm0, %v30_v8 }
  0x11   :  { %206 = vmatprep.mubr.f32.mxu0 %v960_v5  ;;  %367 = vmatprep.mubr.f32.mxu1 %v960_v5 }
  0x14   :  { %777 = vmatmul.mubr.msk.f32.gmra.mrb[8].mxu0 %vm69_vm0, %v31_v9  ;;  %793 = vmatmul.mubr.msk.f32.gmra.mrb[8].mxu1 %vm69_vm0, %v31_v9 }
  0x15   :  { %212 = vmatprep.mubr.f32.mxu0 %v960_v5  ;;  %373 = vmatprep.mubr.f32.mxu1 %v960_v5 }
  0x18   :  { %778 = vmatmul.mubr.msk.f32.gmra.mrb[10].mxu0 %vm69_vm0, %v32_v10  ;;  %794 = vmatmul.mubr.msk.f32.gmra.mrb[10].mxu1 %vm69_vm0, %v32_v10 }
  0x19   :  { %218 = vmatprep.mubr.f32.mxu0 %v960_v5  ;;  %379 = vmatprep.mubr.f32.mxu1 %v960_v5 }
  0x1c   :  { %779 = vmatmul.mubr.msk.f32.gmra.mrb[12].mxu0 %vm69_vm0, %v33_v11  ;;  %795 = vmatmul.mubr.msk.f32.gmra.mrb[12].mxu1 %vm69_vm0, %v33_v11 }
  0x1d   :  { %224 = vmatprep.mubr.f32.mxu0 %v960_v5  ;;  %385 = vmatprep.mubr.f32.mxu1 %v960_v5 }
  0x20   :  { %780 = vmatmul.mubr.msk.f32.gmra.mrb[14].mxu0 %vm69_vm0, %v34_v12  ;;  %796 = vmatmul.mubr.msk.f32.gmra.mrb[14].mxu1 %vm69_vm0, %v34_v12 }
  0x21   :  { %230 = vmatprep.mubr.f32.mxu0 %v960_v5  ;;  %391 = vmatprep.mubr.f32.mxu1 %v960_v5 }
  0x24   :  { %781 = vmatmul.mubr.msk.f32.gmra.mrb[16].mxu0 %vm69_vm0, %v35_v13  ;;  %797 = vmatmul.mubr.msk.f32.gmra.mrb[16].mxu1 %vm69_vm0, %v35_v13 }
  0x25   :  { %236 = vmatprep.mubr.f32.mxu0 %v960_v5  ;;  %397 = vmatprep.mubr.f32.mxu1 %v960_v5 }
  0x28   :  { %782 = vmatmul.mubr.msk.f32.gmra.mrb[18].mxu0 %vm69_vm0, %v36_v14  ;;  %798 = vmatmul.mubr.msk.f32.gmra.mrb[18].mxu1 %vm69_vm0, %v36_v14 }
  0x29   :  { %242 = vmatprep.mubr.f32.mxu0 %v960_v5  ;;  %403 = vmatprep.mubr.f32.mxu1 %v960_v5 }
  0x2c   :  { %783 = vmatmul.mubr.msk.f32.gmra.mrb[20].mxu0 %vm69_vm0, %v37_v15  ;;  %799 = vmatmul.mubr.msk.f32.gmra.mrb[20].mxu1 %vm69_vm0, %v37_v15 }
  0x2d   :  { %248 = vmatprep.mubr.f32.mxu0 %v960_v5  ;;  %409 = vmatprep.mubr.f32.mxu1 %v960_v5 }
  0x30   :  { %784 = vmatmul.mubr.msk.f32.gmra.mrb[22].mxu0 %vm69_vm0, %v38_v16  ;;  %800 = vmatmul.mubr.msk.f32.gmra.mrb[22].mxu1 %vm69_vm0, %v38_v16 }
  0x31   :  { %254 = vmatprep.mubr.f32.mxu0 %v960_v5  ;;  %415 = vmatprep.mubr.f32.mxu1 %v960_v5 }
  0x34   :  { %785 = vmatmul.mubr.msk.f32.gmra.mrb[24].mxu0 %vm69_vm0, %v39_v17  ;;  %801 = vmatmul.mubr.msk.f32.gmra.mrb[24].mxu1 %vm69_vm0, %v39_v17 }
  0x35   :  { %260 = vmatprep.mubr.f32.mxu0 %v960_v5  ;;  %421 = vmatprep.mubr.f32.mxu1 %v960_v5 }
  0x38   :  { %786 = vmatmul.mubr.msk.f32.gmra.mrb[26].mxu0 %vm69_vm0, %v40_v18  ;;  %802 = vmatmul.mubr.msk.f32.gmra.mrb[26].mxu1 %vm69_vm0, %v40_v18 }
  0x39   :  { %266 = vmatprep.mubr.f32.mxu0 %v960_v5  ;;  %427 = vmatprep.mubr.f32.mxu1 %v960_v5 }
  0x3c   :  { %787 = vmatmul.mubr.msk.f32.gmra.mrb[28].mxu0 %vm69_vm0, %v41_v19  ;;  %803 = vmatmul.mubr.msk.f32.gmra.mrb[28].mxu1 %vm69_vm0, %v41_v19 }
  0x3d   :  { %272 = vmatprep.mubr.f32.mxu0 %v960_v5  ;;  %433 = vmatprep.mubr.f32.mxu1 %v960_v5 }
  0x40   :  { %788 = vmatmul.mubr.msk.f32.gmra.mrb[30].mxu0 %vm69_vm0, %v42_v20  ;;  %804 = vmatmul.mubr.msk.f32.gmra.mrb[30].mxu1 %vm69_vm0, %v42_v20 }
  0x41   :  { %701 = vmatprep.mubr.bf16.mxu0 %v961_v21  ;;  %742 = vmatprep.mubr.bf16.mxu1 %v961_v21 }
  0xd7   :  { %v184_v33 = vpop.f32.mrb[0].mxu0  ;;  %v345_v34 = vpop.f32.mrb[0].mxu1 }
  0xd8   :  { %v185_v35 = vadd.f32 %v184_v33, %v1115_v29  ;;  %v346_v36 = vadd.f32 %v345_v34, %v1117_v30  ;;  %v186_v37 = vpop.f32.mrb[1].mxu0  ;;  %v347_v38 = vpop.f32.mrb[1].mxu1 }
  0xd9   :  { %v187_v39 = vadd.f32 %v186_v37, %v1119_v31  ;;  %v348_v40 = vadd.f32 %v347_v38, %v1121_v32 }
  0xda   :  { %808 = vtanh.f32 %v185_v35 }
  0xdb   :  { %810 = vtanh.f32 %v346_v36  ;;  %v190_v41 = vpop.f32.mrb[2].mxu0  ;;  %v351_v42 = vpop.f32.mrb[2].mxu1 }
  0xdc   :  { %812 = vtanh.f32 %v187_v39  ;;  %v191_v43 = vadd.f32 %v190_v41, %v1115_v29  ;;  %v352_v44 = vadd.f32 %v351_v42, %v1117_v30  ;;  %v192_v45 = vpop.f32.mrb[3].mxu0  ;;  %v353_v46 = vpop.f32.mrb[3].mxu1 }
  0xdd   :  { %814 = vtanh.f32 %v348_v40  ;;  %v193_v47 = vadd.f32 %v192_v45, %v1119_v31  ;;  %v354_v48 = vadd.f32 %v353_v46, %v1121_v32 }
  0xde   :  { %816 = vtanh.f32 %v191_v43 }
  0xdf   :  { %818 = vtanh.f32 %v352_v44  ;;  %v196_v49 = vpop.f32.mrb[4].mxu0  ;;  %v357_v50 = vpop.f32.mrb[4].mxu1 }
  0xe0   :  { %820 = vtanh.f32 %v193_v47  ;;  %v197_v51 = vadd.f32 %v196_v49, %v1115_v29  ;;  %v358_v52 = vadd.f32 %v357_v50, %v1117_v30  ;;  %v198_v53 = vpop.f32.mrb[5].mxu0  ;;  %v359_v54 = vpop.f32.mrb[5].mxu1 }
  0xe1   :  { %822 = vtanh.f32 %v354_v48  ;;  %v199_v55 = vadd.f32 %v198_v53, %v1119_v31  ;;  %v360_v56 = vadd.f32 %v359_v54, %v1121_v32 }
  0xe2   :  { %824 = vtanh.f32 %v197_v51 }
  0xe3   :  { %826 = vtanh.f32 %v358_v52  ;;  %v202_v57 = vpop.f32.mrb[6].mxu0  ;;  %v363_v58 = vpop.f32.mrb[6].mxu1 }
  0xe4   :  { %v809_v59 = vpop.eup %808  ;;  %828 = vtanh.f32 %v199_v55  ;;  %v203_v60 = vadd.f32 %v202_v57, %v1115_v29  ;;  %v364_v61 = vadd.f32 %v363_v58, %v1117_v30  ;;  %v204_v62 = vpop.f32.mrb[7].mxu0 }
  0xe5   :  { %v365_v63 = vpop.f32.mrb[7].mxu1  ;;  %v811_v0 = vpop.eup %810  ;;  %v504_v1 = vmul.f32 0.5, %v809_v59  ;;  %830 = vtanh.f32 %v360_v56  ;;  %v205_v2 = vadd.f32 %v204_v62, %v1119_v31 }
  0xe6   :  { %v366_v3 = vadd.f32 %v365_v63, %v1121_v32  ;;  %v813_v4 = vpop.eup %812  ;;  %v506_v5 = vmul.f32 0.5, %v811_v0  ;;  %832 = vtanh.f32 %v203_v60 }
  0xe7   :  { %v815_v6 = vpop.eup %814  ;;  %834 = vtanh.f32 %v364_v61  ;;  %v208_v7 = vpop.f32.mrb[8].mxu0  ;;  %v1139_v10 = vadd.f32 0.5, %v504_v1  ;;  %v505_v15 = vmul.f32 0.5, %v813_v4 }
  0xe8   :  { %v369_v8 = vpop.f32.mrb[8].mxu1  ;;  %v817_v9 = vpop.eup %816  ;;  %836 = vtanh.f32 %v205_v2  ;;  %v209_v11 = vadd.f32 %v208_v7, %v1115_v29  ;;  %v1143_v19 = vadd.f32 0.5, %v506_v5  ;;  %v507_v39 = vmul.f32 0.5, %v815_v6 }
  0xe9   :  { %v210_v12 = vpop.f32.mrb[9].mxu0  ;;  %v371_v13 = vpop.f32.mrb[9].mxu1  ;;  %v508_v16 = vmul.f32 0.5, %v817_v9  ;;  %838 = vtanh.f32 %v366_v3  ;;  %v370_v17 = vadd.f32 %v369_v8, %v1117_v30  ;;  %v569_v43 = vadd.f32 0.5, %v505_v15 }
  0xea   :  { %v819_v14 = vpop.eup %818  ;;  %840 = vtanh.f32 %v209_v11  ;;  %v211_v21 = vadd.f32 %v210_v12, %v1119_v31  ;;  %v372_v25 = vadd.f32 %v371_v13, %v1121_v32 }
  0xeb   :  { %v821_v18 = vpop.eup %820  ;;  %v510_v20 = vmul.f32 0.5, %v819_v14  ;;  %v1146_v23 = vadd.f32 0.5, %v508_v16  ;;  %842 = vtanh.f32 %v370_v17  ;;  %v214_v26 = vpop.f32.mrb[10].mxu0  ;;  %v571_v17 = vadd.f32 0.5, %v507_v39 }
  0xec   :  { %v823_v22 = vpop.eup %822  ;;  %v509_v24 = vmul.f32 0.5, %v821_v18  ;;  %v375_v27 = vpop.f32.mrb[10].mxu1  ;;  %844 = vtanh.f32 %v211_v21  ;;  %v215_v35 = vadd.f32 %v214_v26, %v1115_v29 }
  0xed   :  { %v825_v28 = vpop.eup %824  ;;  %v1149_v33 = vadd.f32 0.5, %v510_v20  ;;  %v511_v34 = vmul.f32 0.5, %v823_v22  ;;  %v216_v36 = vpop.f32.mrb[11].mxu0  ;;  %v637_v40 = vpack.c.bf16 %v1146_v23, %v1139_v10  ;;  %846 = vtanh.f32 %v372_v25 }
  0xee   :  { %v377_v37 = vpop.f32.mrb[11].mxu1  ;;  %v827_v38 = vpop.eup %826  ;;  %v512_v41 = vmul.f32 0.5, %v825_v28  ;;  %848 = vtanh.f32 %v215_v35  ;;  %v573_v47 = vadd.f32 0.5, %v509_v24  ;;  %v376_v49 = vadd.f32 %v375_v27, %v1117_v30 }
  0xef   :  { %v829_v42 = vpop.eup %828  ;;  %v639_v44 = vpack.c.bf16 %v1149_v33, %v1143_v19  ;;  %v514_v45 = vmul.f32 0.5, %v827_v38  ;;  %v1156_v48 = vadd.f32 0.5, %v511_v34  ;;  %v217_v50 = vadd.f32 %v216_v36, %v1119_v31  ;;  %v220_v51 = vpop.f32.mrb[12].mxu0 }
  0xf0   :  { %v831_v46 = vpop.eup %830  ;;  %v381_v52 = vpop.f32.mrb[12].mxu1  ;;  %v1160_v54 = vadd.f32 0.5, %v512_v41  ;;  %v513_v55 = vmul.f32 0.5, %v829_v42  ;;  %v378_v56 = vadd.f32 %v377_v37, %v1121_v32  ;;  %v221_v57 = vadd.f32 %v220_v51, %v1115_v29 }
  0xf1   :  { %v833_v53 = vpop.eup %832  ;;  %v222_v58 = vpop.f32.mrb[13].mxu0  ;;  %v1164_v61 = vadd.f32 0.5, %v514_v45  ;;  %850 = vtanh.f32 %v376_v49  ;;  %v382_v63 = vadd.f32 %v381_v52, %v1117_v30  ;;  %v515_v1 = vmul.f32 0.5, %v831_v46 }
  0xf2   :  { %v383_v59 = vpop.f32.mrb[13].mxu1  ;;  %v835_v60 = vpop.eup %834  ;;  %v516_v62 = vmul.f32 0.5, %v833_v53  ;;  %852 = vtanh.f32 %v217_v50  ;;  %v223_v3 = vadd.f32 %v222_v58, %v1119_v31  ;;  %v638_v13 = vpack.c.bf16 %v573_v47, %v569_v43 }
  0xf3   :  { %v837_v0 = vpop.eup %836  ;;  %v518_v2 = vmul.f32 0.5, %v835_v60  ;;  %854 = vtanh.f32 %v378_v56  ;;  %v384_v7 = vadd.f32 %v383_v59, %v1121_v32  ;;  %v226_v8 = vpop.f32.mrb[14].mxu0  ;;  %v577_v22 = vadd.f32 0.5, %v513_v55 }
  0xf4   :  { %v839_v4 = vpop.eup %838  ;;  %v1168_v5 = vadd.f32 0.5, %v516_v62  ;;  %v517_v6 = vmul.f32 0.5, %v837_v0  ;;  %v387_v9 = vpop.f32.mrb[14].mxu1  ;;  %856 = vtanh.f32 %v221_v57  ;;  %669 = vmatprep.subr.bf16.mxu0 %v638_v13  ;;  %v579_v26 = vadd.f32 0.5, %v515_v1 }
  0xf5   :  { %v841_v10 = vpop.eup %840  ;;  %v1171_v11 = vadd.f32 0.5, %v518_v2  ;;  %v519_v12 = vmul.f32 0.5, %v839_v4  ;;  %v228_v14 = vpop.f32.mrb[15].mxu0  ;;  %858 = vtanh.f32 %v382_v63  ;;  %v640_v28 = vpack.c.bf16 %v1156_v48, %v571_v17  ;;  %670 = vmatpush1.bf16.msra.mxu0 %v637_v40 }
  0xf6   :  { %v389_v15 = vpop.f32.mrb[15].mxu1  ;;  %v843_v16 = vpop.eup %842  ;;  %v641_v18 = vpack.c.bf16 %v1168_v5, %v1160_v54  ;;  %v520_v20 = vmul.f32 0.5, %v841_v10  ;;  %860 = vtanh.f32 %v223_v3  ;;  %v581_v27 = vadd.f32 0.5, %v517_v6 }
  0xf7   :  { %v845_v21 = vpop.eup %844  ;;  %v643_v23 = vpack.c.bf16 %v1171_v11, %v1164_v61  ;;  %v522_v24 = vmul.f32 0.5, %v843_v16  ;;  %862 = vtanh.f32 %v384_v7  ;;  %v232_v34 = vpop.f32.mrb[16].mxu0  ;;  %v583_v37 = vadd.f32 0.5, %v519_v12  ;;  %710 = vmatprep.subr.bf16.mxu1 %v640_v28 }
  0xf8   :  { %v847_v25 = vpop.eup %846  ;;  %v393_v35 = vpop.f32.mrb[16].mxu1  ;;  %v1178_v38 = vadd.f32 0.5, %v520_v20  ;;  %v227_v39 = vadd.f32 %v226_v8, %v1115_v29  ;;  %v388_v41 = vadd.f32 %v387_v9, %v1117_v30  ;;  %v521_v45 = vmul.f32 0.5, %v845_v21  ;;  %711 = vmatpush1.bf16.msra.mxu1 %v639_v44 }
  0xf9   :  { %v849_v36 = vpop.eup %848  ;;  %v234_v42 = vpop.f32.mrb[17].mxu0  ;;  %v229_v47 = vadd.f32 %v228_v14, %v1119_v31  ;;  %v390_v48 = vadd.f32 %v389_v15, %v1121_v32  ;;  %v1184_v40 = vadd.f32 0.5, %v522_v24  ;;  %v523_v49 = vmul.f32 0.5, %v847_v25 }
  0xfa   :  { %v395_v43 = vpop.f32.mrb[17].mxu1  ;;  %v524_v46 = vmul.f32 0.5, %v849_v36  ;;  %864 = vtanh.f32 %v227_v39  ;;  %v233_v50 = vadd.f32 %v232_v34, %v1115_v29  ;;  %v394_v53 = vadd.f32 %v393_v35, %v1117_v30 }
  0xfb   :  { %v851_v51 = vpop.eup %850  ;;  %866 = vtanh.f32 %v388_v41  ;;  %v235_v55 = vadd.f32 %v234_v42, %v1119_v31  ;;  %v238_v56 = vpop.f32.mrb[18].mxu0  ;;  %v642_v60 = vpack.c.bf16 %v581_v27, %v577_v22  ;;  %v644_v61 = vpack.c.bf16 %v583_v37, %v579_v26 }
  0xfc   :  { %v1190_v52 = vadd.f32 0.5, %v524_v46  ;;  %v399_v57 = vpop.f32.mrb[18].mxu1  ;;  %v853_v58 = vpop.eup %852  ;;  %v526_v59 = vmul.f32 0.5, %v851_v51  ;;  %868 = vtanh.f32 %v229_v47  ;;  %v396_v0 = vadd.f32 %v395_v43, %v1121_v32 }
  0xfd   :  { %v240_v19 = vpop.f32.mrb[19].mxu0  ;;  %v401_v33 = vpop.f32.mrb[19].mxu1  ;;  %v525_v63 = vmul.f32 0.5, %v853_v58  ;;  %870 = vtanh.f32 %v390_v48  ;;  %671 = vmatprep.subr.bf16.mxu0 %v642_v60  ;;  %712 = vmatprep.subr.bf16.mxu1 %v644_v61  ;;  %v239_v4 = vadd.f32 %v238_v56, %v1115_v29  ;;  %v400_v9 = vadd.f32 %v399_v57, %v1117_v30 }
  0xfe   :  { %v855_v44 = vpop.eup %854  ;;  %v645_v62 = vpack.c.bf16 %v1190_v52, %v1178_v38  ;;  %v1197_v2 = vadd.f32 0.5, %v526_v59  ;;  %872 = vtanh.f32 %v233_v50  ;;  %672 = vmatpush1.bf16.msra.mxu0 %v641_v18  ;;  %713 = vmatpush1.bf16.msra.mxu1 %v643_v23  ;;  %v241_v15 = vadd.f32 %v240_v19, %v1119_v31 }
  0xff   :  { %v857_v1 = vpop.eup %856  ;;  %v527_v3 = vmul.f32 0.5, %v855_v44  ;;  %v589_v7 = vadd.f32 0.5, %v525_v63  ;;  %874 = vtanh.f32 %v394_v53  ;;  %v244_v10 = vpop.f32.mrb[20].mxu0  ;;  %v585_v21 = vadd.f32 0.5, %v521_v45 }
 0x100   :  { %v859_v6 = vpop.eup %858  ;;  %v528_v8 = vmul.f32 0.5, %v857_v1  ;;  %v405_v11 = vpop.f32.mrb[20].mxu1  ;;  %v647_v13 = vpack.c.bf16 %v1197_v2, %v1184_v40  ;;  %876 = vtanh.f32 %v235_v55  ;;  %v402_v54 = vadd.f32 %v401_v33, %v1121_v32 }
 0x101   :  { %v861_v12 = vpop.eup %860  ;;  %v530_v14 = vmul.f32 0.5, %v859_v6  ;;  %v246_v16 = vpop.f32.mrb[21].mxu0  ;;  %v591_v22 = vadd.f32 0.5, %v527_v3  ;;  %878 = vtanh.f32 %v396_v0  ;;  %v587_v5 = vadd.f32 0.5, %v523_v49 }
 0x102   :  { %v407_v17 = vpop.f32.mrb[21].mxu1  ;;  %v863_v20 = vpop.eup %862  ;;  %v1208_v18 = vadd.f32 0.5, %v528_v8  ;;  %880 = vtanh.f32 %v239_v4  ;;  %v245_v23 = vadd.f32 %v244_v10, %v1115_v29  ;;  %v529_v25 = vmul.f32 0.5, %v861_v12 }
 0x103   :  { %v1211_v24 = vadd.f32 0.5, %v530_v14  ;;  %882 = vtanh.f32 %v400_v9  ;;  %v406_v26 = vadd.f32 %v405_v11, %v1117_v30  ;;  %v250_v27 = vpop.f32.mrb[22].mxu0  ;;  %v411_v28 = vpop.f32.mrb[22].mxu1  ;;  %v531_v35 = vmul.f32 0.5, %v863_v20 }
 0x104   :  { %v865_v34 = vpop.eup %864  ;;  %884 = vtanh.f32 %v241_v15  ;;  %v247_v36 = vadd.f32 %v246_v16, %v1119_v31  ;;  %v646_v37 = vpack.c.bf16 %v589_v7, %v585_v21  ;;  %v252_v39 = vpop.f32.mrb[23].mxu0  ;;  %v408_v45 = vadd.f32 %v407_v17, %v1121_v32 }
 0x105   :  { %v413_v41 = vpop.f32.mrb[23].mxu1  ;;  %v867_v42 = vpop.eup %866  ;;  %v532_v43 = vmul.f32 0.5, %v865_v34  ;;  %886 = vtanh.f32 %v402_v54  ;;  %v648_v46 = vpack.c.bf16 %v591_v22, %v587_v5  ;;  %v251_v40 = vadd.f32 %v250_v27, %v1115_v29 }
 0x106   :  { %v869_v47 = vpop.eup %868  ;;  %v534_v48 = vmul.f32 0.5, %v867_v42  ;;  %888 = vtanh.f32 %v245_v23  ;;  %673 = vmatprep.subr.bf16.mxu0 %v646_v37  ;;  %v412_v49 = vadd.f32 %v411_v28, %v1117_v30  ;;  %v253_v55 = vadd.f32 %v252_v39, %v1119_v31 }
 0x107   :  { %v871_v50 = vpop.eup %870  ;;  %v1218_v51 = vadd.f32 0.5, %v532_v43  ;;  %v533_v53 = vmul.f32 0.5, %v869_v47  ;;  %890 = vtanh.f32 %v406_v26  ;;  %714 = vmatprep.subr.bf16.mxu1 %v648_v46  ;;  %674 = vmatpush1.bf16.msra.mxu0 %v645_v62  ;;  %v256_v56 = vpop.f32.mrb[24].mxu0  ;;  %v414_v61 = vadd.f32 %v413_v41, %v1121_v32 }
 0x108   :  { %v417_v57 = vpop.f32.mrb[24].mxu1  ;;  %v873_v58 = vpop.eup %872  ;;  %v1224_v59 = vadd.f32 0.5, %v534_v48  ;;  %v535_v60 = vmul.f32 0.5, %v871_v50  ;;  %892 = vtanh.f32 %v247_v36  ;;  %715 = vmatpush1.bf16.msra.mxu1 %v647_v13  ;;  %v257_v52 = vadd.f32 %v256_v56, %v1115_v29 }
 0x109   :  { %v258_v19 = vpop.f32.mrb[25].mxu0  ;;  %v419_v33 = vpop.f32.mrb[25].mxu1  ;;  %v649_v63 = vpack.c.bf16 %v1218_v51, %v1208_v18  ;;  %v536_v38 = vmul.f32 0.5, %v873_v58  ;;  %894 = vtanh.f32 %v408_v45  ;;  %v597_v1 = vadd.f32 0.5, %v533_v53 }
 0x10a   :  { %v875_v44 = vpop.eup %874  ;;  %v651_v0 = vpack.c.bf16 %v1224_v59, %v1211_v24  ;;  %896 = vtanh.f32 %v251_v40  ;;  %v593_v4 = vadd.f32 0.5, %v529_v25  ;;  %v599_v6 = vadd.f32 0.5, %v535_v60 }
 0x10b   :  { %v877_v62 = vpop.eup %876  ;;  %v538_v2 = vmul.f32 0.5, %v875_v44  ;;  %898 = vtanh.f32 %v412_v49  ;;  %v262_v7 = vpop.f32.mrb[26].mxu0  ;;  %v595_v10 = vadd.f32 0.5, %v531_v35  ;;  %v1232_v11 = vadd.f32 0.5, %v536_v38 }
 0x10c   :  { %v879_v3 = vpop.eup %878  ;;  %v423_v8 = vpop.f32.mrb[26].mxu1  ;;  %900 = vtanh.f32 %v253_v55  ;;  %v418_v12 = vadd.f32 %v417_v57, %v1117_v30  ;;  %v537_v16 = vmul.f32 0.5, %v877_v62  ;;  %v259_v20 = vadd.f32 %v258_v19, %v1119_v31 }
 0x10d   :  { %v881_v9 = vpop.eup %880  ;;  %v264_v13 = vpop.f32.mrb[27].mxu0  ;;  %902 = vtanh.f32 %v414_v61  ;;  %v1236_v22 = vadd.f32 0.5, %v538_v2  ;;  %v650_v5 = vpack.c.bf16 %v597_v1, %v593_v4  ;;  %v420_v25 = vadd.f32 %v419_v33, %v1121_v32 }
 0x10e   :  { %v425_v14 = vpop.f32.mrb[27].mxu1  ;;  %v883_v15 = vpop.eup %882  ;;  %v540_v17 = vmul.f32 0.5, %v881_v9  ;;  %904 = vtanh.f32 %v257_v52  ;;  %v652_v26 = vpack.c.bf16 %v599_v6, %v595_v10  ;;  %v263_v37 = vadd.f32 %v262_v7, %v1115_v29 }
 0x10f   :  { %v885_v21 = vpop.eup %884  ;;  %v542_v54 = vmul.f32 0.5, %v883_v15  ;;  %v268_v27 = vpop.f32.mrb[28].mxu0  ;;  %906 = vtanh.f32 %v418_v12  ;;  %675 = vmatprep.subr.bf16.mxu0 %v650_v5  ;;  %v539_v47 = vmul.f32 0.5, %v879_v3  ;;  %v601_v50 = vadd.f32 0.5, %v537_v16 }
 0x110   :  { %v887_v18 = vpop.eup %886  ;;  %v1238_v23 = vadd.f32 0.5, %v540_v17  ;;  %v541_v24 = vmul.f32 0.5, %v885_v21  ;;  %v429_v28 = vpop.f32.mrb[28].mxu1  ;;  %908 = vtanh.f32 %v259_v20  ;;  %716 = vmatprep.subr.bf16.mxu1 %v652_v26  ;;  %676 = vmatpush1.bf16.msra.mxu0 %v649_v63  ;;  %v424_v51 = vadd.f32 %v423_v8, %v1117_v30 }
 0x111   :  { %v889_v34 = vpop.eup %888  ;;  %v1241_v35 = vadd.f32 0.5, %v542_v54  ;;  %v543_v36 = vmul.f32 0.5, %v887_v18  ;;  %v270_v39 = vpop.f32.mrb[29].mxu0  ;;  %717 = vmatpush1.bf16.msra.mxu1 %v651_v0  ;;  %910 = vtanh.f32 %v263_v37  ;;  %v265_v53 = vadd.f32 %v264_v13, %v1119_v31 }
 0x112   :  { %v431_v41 = vpop.f32.mrb[29].mxu1  ;;  %v891_v42 = vpop.eup %890  ;;  %v653_v43 = vpack.c.bf16 %v1238_v23, %v1232_v11  ;;  %v544_v45 = vmul.f32 0.5, %v889_v34  ;;  %912 = vtanh.f32 %v420_v25  ;;  %v605_v58 = vadd.f32 0.5, %v541_v24 }
 0x113   :  { %v893_v46 = vpop.eup %892  ;;  %v655_v48 = vpack.c.bf16 %v1241_v35, %v1236_v22  ;;  %v546_v40 = vmul.f32 0.5, %v891_v42  ;;  %v274_v55 = vpop.f32.mrb[30].mxu0  ;;  %v607_v59 = vadd.f32 0.5, %v543_v36  ;;  %v426_v61 = vadd.f32 %v425_v14, %v1121_v32 }
 0x114   :  { %v895_v49 = vpop.eup %894  ;;  %v435_v56 = vpop.f32.mrb[30].mxu1  ;;  %v1250_v60 = vadd.f32 0.5, %v544_v45  ;;  %v545_v38 = vmul.f32 0.5, %v893_v46  ;;  %914 = vtanh.f32 %v424_v51  ;;  %v269_v2 = vadd.f32 %v268_v27, %v1115_v29 }
 0x115   :  { %v897_v57 = vpop.eup %896  ;;  %v276_v19 = vpop.f32.mrb[31].mxu0  ;;  %v1253_v63 = vadd.f32 0.5, %v546_v40  ;;  %v547_v0 = vmul.f32 0.5, %v895_v49  ;;  %916 = vtanh.f32 %v265_v53  ;;  %v430_v7 = vadd.f32 %v429_v28, %v1117_v30 }
 0x116   :  { %v437_v33 = vpop.f32.mrb[31].mxu1  ;;  %v899_v44 = vpop.eup %898  ;;  %v548_v52 = vmul.f32 0.5, %v897_v57  ;;  %918 = vtanh.f32 %v426_v61  ;;  %v271_v11 = vadd.f32 %v270_v39, %v1119_v31  ;;  %v654_v12 = vpack.c.bf16 %v605_v58, %v601_v50 }
 0x117   :  { %v901_v62 = vpop.eup %900  ;;  %v550_v1 = vmul.f32 0.5, %v899_v44  ;;  %v603_v13 = vadd.f32 0.5, %v539_v47  ;;  %v432_v15 = vadd.f32 %v431_v41, %v1121_v32  ;;  %920 = vtanh.f32 %v269_v2 }
 0x118   :  { %v903_v3 = vpop.eup %902  ;;  %v612_v4 = vadd.f32 0.5, %v548_v52  ;;  %v549_v6 = vmul.f32 0.5, %v901_v62  ;;  %677 = vmatprep.subr.bf16.mxu0 %v654_v12  ;;  %v609_v5 = vadd.f32 0.5, %v545_v38  ;;  %922 = vtanh.f32 %v430_v7 }
 0x119   :  { %v905_v8 = vpop.eup %904  ;;  %v614_v9 = vadd.f32 0.5, %v550_v1  ;;  %v551_v10 = vmul.f32 0.5, %v903_v3  ;;  %v656_v23 = vpack.c.bf16 %v607_v59, %v603_v13  ;;  %678 = vmatpush1.bf16.msra.mxu0 %v653_v43  ;;  %v611_v25 = vadd.f32 0.5, %v547_v0 }
 0x11a   :  { %v657_v14 = vpack.c.bf16 %v612_v4, %v1250_v60  ;;  %v907_v16 = vpop.eup %906  ;;  %v613_v20 = vadd.f32 0.5, %v549_v6  ;;  %v552_v18 = vmul.f32 0.5, %v905_v8  ;;  %924 = vtanh.f32 %v271_v11 }
 0x11b   :  { %v659_v17 = vpack.c.bf16 %v614_v9, %v1253_v63  ;;  %v615_v21 = vadd.f32 0.5, %v551_v10  ;;  %v909_v54 = vpop.eup %908  ;;  %v275_v26 = vadd.f32 %v274_v55, %v1115_v29  ;;  %v436_v27 = vadd.f32 %v435_v56, %v1117_v30  ;;  %718 = vmatprep.subr.bf16.mxu1 %v656_v23 }
 0x11c   :  { %v911_v24 = vpop.eup %910  ;;  %926 = vtanh.f32 %v432_v15  ;;  %v277_v36 = vadd.f32 %v276_v19, %v1119_v31  ;;  %v438_v37 = vadd.f32 %v437_v33, %v1121_v32  ;;  %v554_v39 = vmul.f32 0.5, %v907_v16  ;;  %719 = vmatpush1.bf16.msra.mxu1 %v655_v48 }
 0x11d   :  { %v913_v28 = vpop.eup %912  ;;  %v556_v34 = vmul.f32 0.5, %v911_v24  ;;  %928 = vtanh.f32 %v275_v26  ;;  %v658_v41 = vpack.c.bf16 %v613_v20, %v609_v5  ;;  %v660_v42 = vpack.c.bf16 %v615_v21, %v611_v25  ;;  %v636_v21 = vld [vmem:[%s1286_s3] sm:$0xf] }
 0x11e   :  { %v915_v43 = vpop.eup %914  ;;  %v616_v29 = vadd.f32 0.5, %v552_v18  ;;  %v553_v45 = vmul.f32 0.5, %v909_v54  ;;  %930 = vtanh.f32 %v436_v27  ;;  %v555_v47 = vmul.f32 0.5, %v913_v28 }
 0x11f   :  { %v620_v30 = vadd.f32 0.5, %v556_v34  ;;  %v917_v46 = vpop.eup %916  ;;  %v558_v40 = vmul.f32 0.5, %v915_v43  ;;  %932 = vtanh.f32 %v277_v36  ;;  %679 = vmatprep.subr.bf16.mxu0 %v658_v41  ;;  %720 = vmatprep.subr.bf16.mxu1 %v660_v42  ;;  %v618_v22 = vadd.f32 0.5, %v554_v39 }
 0x120   :  { %v919_v31 = vpop.eup %918  ;;  %v557_v49 = vmul.f32 0.5, %v917_v46  ;;  %934 = vtanh.f32 %v438_v37  ;;  %680 = vmatpush1.bf16.msra.mxu0 %v657_v14  ;;  %721 = vmatpush1.bf16.msra.mxu1 %v659_v17  ;;  %v617_v50 = vadd.f32 0.5, %v553_v45  ;;  %v619_v55 = vadd.f32 0.5, %v555_v47 }
 0x121   :  { %v661_v32 = vpack.c.bf16 %v620_v30, %v616_v29  ;;  %v622_v35 = vadd.f32 0.5, %v558_v40  ;;  %v559_v48 = vmul.f32 0.5, %v919_v31  ;;  %v921_v53 = vpop.eup %920 }
 0x122   :  { %v621_v51 = vadd.f32 0.5, %v557_v49  ;;  %v923_v58 = vpop.eup %922  ;;  %v560_v33 = vmul.f32 0.5, %v921_v53 }
 0x123   :  { %v663_v56 = vpack.c.bf16 %v622_v35, %v618_v22  ;;  %v623_v57 = vadd.f32 0.5, %v559_v48  ;;  %v562_v63 = vmul.f32 0.5, %v923_v58 }
 0x124   :  { %v662_v59 = vpack.c.bf16 %v621_v51, %v617_v50  ;;  %v925_v60 = vpop.eup %924  ;;  %v624_v4 = vadd.f32 0.5, %v560_v33 }
 0x125   :  { %v664_v61 = vpack.c.bf16 %v623_v57, %v619_v55  ;;  %v561_v52 = vmul.f32 0.5, %v925_v60  ;;  %v626_v8 = vadd.f32 0.5, %v562_v63 }
 0x126   :  { %v927_v19 = vpop.eup %926  ;;  %681 = vmatprep.subr.bf16.mxu0 %v662_v59 }
 0x127   :  { %v929_v44 = vpop.eup %928  ;;  %722 = vmatprep.subr.bf16.mxu1 %v664_v61  ;;  %682 = vmatpush1.bf16.msra.mxu0 %v661_v32  ;;  %v563_v1 = vmul.f32 0.5, %v927_v19  ;;  %v625_v11 = vadd.f32 0.5, %v561_v52 }
 0x128   :  { %v931_v38 = vpop.eup %930  ;;  %v564_v62 = vmul.f32 0.5, %v929_v44  ;;  %723 = vmatpush1.bf16.msra.mxu1 %v663_v56 }
 0x129   :  { %v933_v0 = vpop.eup %932  ;;  %v566_v2 = vmul.f32 0.5, %v931_v38  ;;  %v627_v14 = vadd.f32 0.5, %v563_v1 }
 0x12a   :  { %v935_v3 = vpop.eup %934  ;;  %v628_v6 = vadd.f32 0.5, %v564_v62  ;;  %v565_v7 = vmul.f32 0.5, %v933_v0 }
 0x12b   :  { %v630_v9 = vadd.f32 0.5, %v566_v2  ;;  %v567_v10 = vmul.f32 0.5, %v935_v3 }
 0x12c   :  { %v665_v12 = vpack.c.bf16 %v628_v6, %v624_v4  ;;  %v629_v13 = vadd.f32 0.5, %v565_v7 }
 0x12d   :  { %v667_v15 = vpack.c.bf16 %v630_v9, %v626_v8  ;;  %v631_v16 = vadd.f32 0.5, %v567_v10 }
 0x12e   :  { %v666_v17 = vpack.c.bf16 %v629_v13, %v625_v11 }
 0x12f   :  { %v668_v20 = vpack.c.bf16 %v631_v16, %v627_v14 }
 0x130   :  { %683 = vmatprep.subr.bf16.mxu0 %v666_v17 }
 0x131   :  { %724 = vmatprep.subr.bf16.mxu1 %v668_v20  ;;  %684 = vmatpush1.bf16.msra.mxu0 %v665_v12 }
 0x132   :  { %725 = vmatpush1.bf16.msra.mxu1 %v667_v15 }
 0x134   :  { %702 = vmatmul.mubr.bf16.vlgmr.msra.gmra.mrb[32].mxu0 %v636_v21 }
 0x135   :  { %743 = vmatmul.mubr.bf16.vlgmr.msra.gmra.mrb[32].mxu1 %v636_v21 }
 0x207   :  { %v703_v54 = vpop.f32.mrb[32].mxu0 }
 0x208   :  { %v744_v5 = vpop.f32.mrb[32].mxu1  ;;  %v705_v18 = vpop.f32.mrb[33].mxu0  ;;  %755 = vst [vmem:[#allocation2] sm:$0xff] %v703_v54 }
 0x209   :  { %v746_v23 = vpop.f32.mrb[33].mxu1  ;;  %v707_v24 = vpop.f32.mrb[34].mxu0  ;;  %757 = vst [vmem:[#allocation2 + $0x10] sm:$0xff] %v744_v5  ;;  %756 = vst [vmem:[#allocation2 + $0x8] sm:$0xff] %v705_v18 }
 0x20a   :  { %v748_v25 = vpop.f32.mrb[34].mxu1  ;;  %v708_v26 = vpop.f32.mrb[35].mxu0  ;;  %758 = vst [vmem:[#allocation2 + $0x18] sm:$0xff] %v746_v23 }
 0x20b   :  { %v749_v27 = vpop.f32.mrb[35].mxu1 }
 0x20c   :  { %947 = shalt.err (!%p944_p4)
}
 0x20d   :  { %s948_s7 = scalar_lea.hbm %s1287_s4, 512 }
 0x20e   :  { %p949_p5 = scmp.ne.s32.totalorder %s1287_s4, %s948_s7  ;;  %p952_p6 = scmp.lt.u32.totalorder %s948_s7, %s1287_s4 }
 0x210   :  { %p954_p7 = pnand %p952_p6, %p949_p5 }
 0x212   :  { %957 = shalt.err (!%p954_p7)
}
 0x213   :  { %768 = dma.vmem_to_hbm [thread:$0]  %s766_s30, 512, %s1287_s4, [#allocation3]  }
 0x214   :  { %958 = dma.done.wait [#allocation3], 512  }
 0x215   :  { %959 = vsyncadd [#allocation3], 4294966784 }
 0x216   :  { %772 = vsyncpa [#allocation3], 1 }

</bundles_post_ra>
